<compile_context>
chip_gen: v6e
topology: v6e:2x2x1
jax: 0.10.0
libtpu: 0.0.40
codegen_flags: <defaults>
</compile_context>

<pallas_src>
import jax
import jax.numpy as jnp
from jax.experimental import pallas as pl
from jax.experimental.pallas import tpu as pltpu


def _add_kernel(y_ref, x_ref, o_ref):
    # Elementwise hot path: out = y + x on the current VMEM tile.
    # Pure HBM-bandwidth-bound; the VPU work is trivially hidden under DMA.
    o_ref[...] = y_ref[...] + x_ref[...]


def _lane_dense_2d(shape, total):
    """Pick a (rows, cols) factorization with a wide, 128-aligned lane axis."""
    for lanes in (32768, 16384, 8192, 4096, 2048, 1024, 512, 256, 128):
        if total % lanes == 0:
            return total // lanes, lanes
    # Fallback: keep the natural last dim as the (full) lane axis. A block
    # whose last dim equals the full array dim is exempt from the
    # 128-divisibility requirement.
    cols = shape[-1]
    return total // cols, cols


def _pick_row_tile(rows, cols, itemsize, sublane, target_tile_bytes):
    """Row-tile: multiple of `sublane`, ~target bytes, divisor of rows if possible."""
    max_tile_r = (target_tile_bytes // max(1, cols * itemsize)) // sublane * sublane
    max_tile_r = max(sublane, max_tile_r)
    max_tile_r = min(max_tile_r, rows)
    if max_tile_r >= rows:
        return rows  # single (or full-extent) tile; exempt from divisibility rule
    # Prefer an exact divisor of `rows` so the last grid step is a full,
    # unmasked tile.
    t = (max_tile_r // sublane) * sublane
    while t >= sublane:
        if rows % t == 0:
            return t
        t -= sublane
    # No sublane-multiple divisor <= target: fall back to ragged last tile.
    return max_tile_r


def level_fuse(y: jax.Array, x: jax.Array, *,
               target_tile_bytes: int = 2 * 1024 * 1024) -> jax.Array:
    """Pallas implementation of Level_Fuse.forward (default args): y + x."""
    assert y.shape == x.shape, "Level_Fuse requires y and x of equal shape"
    assert y.dtype == x.dtype
    orig_shape = y.shape
    total = int(y.size)
    itemsize = jnp.dtype(y.dtype).itemsize
    # Sublane granularity: 8 (f32) / 16 (bf16) / 32 (int8 / fp8).
    sublane = max(8, 32 // itemsize)

    rows, cols = _lane_dense_2d(orig_shape, total)
    y2 = y.reshape(rows, cols)
    x2 = x.reshape(rows, cols)

    tile_r = _pick_row_tile(rows, cols, itemsize, sublane, target_tile_bytes)
    grid = (pl.cdiv(rows, tile_r),)

    out2 = pl.pallas_call(
        _add_kernel,
        out_shape=jax.ShapeDtypeStruct((rows, cols), y.dtype),
        grid=grid,
        in_specs=[
            pl.BlockSpec((tile_r, cols), lambda i: (i, 0)),
            pl.BlockSpec((tile_r, cols), lambda i: (i, 0)),
        ],
        out_specs=pl.BlockSpec((tile_r, cols), lambda i: (i, 0)),
        compiler_params=pltpu.CompilerParams(
            # Tiles are independent: lets v7x shard grid steps across both TCs;
            # harmless on the single-TC v5e / v6e.
            dimension_semantics=("parallel",),
        ),
    )(y2, x2)

    return out2.reshape(orig_shape)


if __name__ == "__main__":
    key = jax.random.PRNGKey(0)
    ky, kx = jax.random.split(key)

    # Primary small NCHW example consistent with the module.
    shape = (2, 4, 16, 16)
    y = jax.random.normal(ky, shape, dtype=jnp.float32)
    x = jax.random.normal(kx, shape, dtype=jnp.float32)
    out = jax.block_until_ready(level_fuse(y, x))
    assert out.shape == shape
    assert jnp.allclose(out, y + x, atol=1e-6, rtol=1e-6)

    # Second check: force >1 grid step to exercise the tiled pipeline
    # (and the exact-divisor row-tile path).
    shape2 = (8, 16, 32, 32)
    y2 = jax.random.normal(ky, shape2, dtype=jnp.float32)
    x2 = jax.random.normal(kx, shape2, dtype=jnp.float32)
    out2 = jax.block_until_ready(
        level_fuse(y2, x2, target_tile_bytes=128 * 1024))
    assert jnp.allclose(out2, y2 + x2, atol=1e-6, rtol=1e-6)

    # Third check: odd shape that is not a multiple of 128 elements
    # (exercises the full-extent last-dim fallback).
    shape3 = (2, 3, 10, 10)
    y3 = jax.random.normal(ky, shape3, dtype=jnp.float32)
    x3 = jax.random.normal(kx, shape3, dtype=jnp.float32)
    out3 = jax.block_until_ready(level_fuse(y3, x3))
    assert jnp.allclose(out3, y3 + x3, atol=1e-6, rtol=1e-6)

    print("KERNEL_OK")
</pallas_src>

<mosaic_0001>
module attributes {stable_mosaic.version = 11 : i64} {
  func.func @_add_kernel(%arg0: i32, %arg1: memref<1x2048xf32, #tpu.memory_space<vmem>>, %arg2: memref<1x2048xf32, #tpu.memory_space<vmem>>, %arg3: memref<1x2048xf32, #tpu.memory_space<vmem>>) attributes {dimension_semantics = [#tpu.dimension_semantics<parallel>], iteration_bounds = array<i64: 1>, scalar_prefetch = 0 : i64, scratch_operands = 0 : i64, tpu.core_type = #tpu.core_type<tc>, window_params = [{transform_indices = @transform_0, window_bounds = array<i64: 1, 2048>}, {transform_indices = @transform_1, window_bounds = array<i64: 1, 2048>}, {transform_indices = @transform_2, window_bounds = array<i64: 1, 2048>}]} {
    %c0 = arith.constant 0 : index
    %c0_0 = arith.constant 0 : index
    %0 = vector.load %arg1[%c0, %c0_0] : memref<1x2048xf32, #tpu.memory_space<vmem>>, vector<1x2048xf32>
    %c0_1 = arith.constant 0 : index
    %c0_2 = arith.constant 0 : index
    %1 = vector.load %arg2[%c0_1, %c0_2] : memref<1x2048xf32, #tpu.memory_space<vmem>>, vector<1x2048xf32>
    %2 = arith.addf %0, %1 : vector<1x2048xf32>
    %c0_3 = arith.constant 0 : index
    %c0_4 = arith.constant 0 : index
    %3 = vector.load %arg3[%c0_3, %c0_4] : memref<1x2048xf32, #tpu.memory_space<vmem>>, vector<1x2048xf32>
    tpu.vector_store %arg3[%c0_3, %c0_4], %2 {strides = array<i32>} : memref<1x2048xf32, #tpu.memory_space<vmem>>, vector<1x2048xf32>,
    return
  }
  func.func @transform_0(%arg0: i32) -> (i32, i32) {
    %c0_i32 = arith.constant 0 : i32
    %c0_i32_0 = arith.constant 0 : i32
    return %arg0, %c0_i32 : i32, i32
  }
  func.func @transform_1(%arg0: i32) -> (i32, i32) {
    %c0_i32 = arith.constant 0 : i32
    %c0_i32_0 = arith.constant 0 : i32
    return %arg0, %c0_i32 : i32, i32
  }
  func.func @transform_2(%arg0: i32) -> (i32, i32) {
    %c0_i32 = arith.constant 0 : i32
    %c0_i32_0 = arith.constant 0 : i32
    return %arg0, %c0_i32 : i32, i32
  }
}

</mosaic_0001>

<bundles_post_ra>
// kernel: tpu_custom_call.1
= control target key start
LH: loop header
LB: loop body
LE: loop exit
PB: predicated region body
PF: predicated region fallthrough
CT: control target
= control target key end

     0   :  { %7 = vsyncpa [#allocation3], 0  ;;  %s156_s0 = inlined_call_operand.hbm [shape: f32[1,2048], index: 0, kind: input, shape index: {}]   ;;  %s157_s1 = inlined_call_operand.hbm [shape: f32[1,2048], index: 1, kind: input, shape index: {}]   ;;  %s158_s2 = inlined_call_operand.hbm [shape: f32[1,2048], index: 2, kind: output, shape index: {}]  }
   0x1   :  { %8 = vsyncpa [#allocation6], 0 }
   0x2   :  { %9 = vsyncpa [#allocation4], 0  ;;  %s129_s9 = smov [#allocation2]   ;;  %s130_s11 = smov [#allocation5]  }
   0x3   :  { %s16_s10 = sshll.u32 %s129_s9, 4  ;;  %s26_s12 = sshll.u32 %s130_s11, 4  ;;  %s17_s10 = int_to_ptr.vmem [resolvable:$true] %s16_s10  ;;  %s27_s12 = int_to_ptr.vmem [resolvable:$true] %s26_s12 }
   0x4   :  { %s71_s13 = scalar_lea.vmem %s17_s10, 256  ;;  %p76_p1 = scmp.lt.s32.totalorder %s17_s10, %s17_s10 }
   0x5   :  { %p72_p0 = scmp.ne.s32.totalorder %s17_s10, %s71_s13  ;;  %p77_p2 = scmp.lt.s32.totalorder %s71_s13, %s71_s13 }
   0x7   :  { %p78_p3 = por %p77_p2, %p76_p1 }
   0x9   :  { %p79_p4 = pnand %p78_p3, %p72_p0 }
   0xb   :  { %82 = shalt.err (!%p79_p4)
}
   0xc   :  { %19 = dma.hbm_to_vmem [thread:$0]  %s156_s0, 256, %s17_s10, [#allocation3]  }
   0xd   :  { %s91_s16 = scalar_lea.vmem %s27_s12, 256  ;;  %p96_p6 = scmp.lt.s32.totalorder %s27_s12, %s27_s12 }
   0xe   :  { %p92_p5 = scmp.ne.s32.totalorder %s27_s12, %s91_s16  ;;  %p97_p7 = scmp.lt.s32.totalorder %s91_s16, %s91_s16 }
  0x10   :  { %p98_p8 = por %p97_p7, %p96_p6 }
  0x12   :  { %p99_p9 = pnand %p98_p8, %p92_p5 }
  0x14   :  { %102 = shalt.err (!%p99_p9)
}
  0x15   :  { %29 = dma.hbm_to_vmem [thread:$0]  %s157_s1, 256, %s27_s12, [#allocation6]  }
  0x16   :  { %123 = dma.done.wait [#allocation3], 256  }
  0x17   :  { %124 = vsyncadd [#allocation3], 4294967040 }
  0x18   :  { %125 = dma.done.wait [#allocation6], 256  }
  0x19   :  { %126 = vsyncadd [#allocation6], 4294967040  ;;  %s131_s19 = smov [#allocation7]   ;;  %v36_v0 = vld [vmem:[#allocation2] sm:$0xff]  ;;  %v38_v1 = vld [vmem:[#allocation5] sm:$0xff] }
  0x1a   :  { %s50_s20 = sshll.u32 %s131_s19, 4  ;;  %v37_v2 = vld [vmem:[#allocation2 + $0x8] sm:$0xff]  ;;  %v40_v3 = vadd.f32 %v38_v1, %v36_v0  ;;  %v39_v4 = vld [vmem:[#allocation5 + $0x8] sm:$0xff]  ;;  %s51_s20 = int_to_ptr.vmem [resolvable:$true] %s50_s20 }
  0x1b   :  { %v41_v5 = vadd.f32 %v39_v4, %v37_v2  ;;  %s103_s0 = scalar_lea.vmem %s51_s20, 256  ;;  %p108_p11 = scmp.lt.s32.totalorder %s51_s20, %s51_s20 }
  0x1c   :  { %42 = vst [vmem:[#allocation7] sm:$0xff] %v40_v3  ;;  %p104_p10 = scmp.ne.s32.totalorder %s51_s20, %s103_s0  ;;  %p109_p12 = scmp.lt.s32.totalorder %s103_s0, %s103_s0 }
  0x1d   :  { %43 = vst [vmem:[#allocation7 + $0x8] sm:$0xff] %v41_v5 }
  0x1e   :  { %p110_p13 = por %p109_p12, %p108_p11 }
  0x20   :  { %p111_p0 = pnand %p110_p13, %p104_p10 }
  0x22   :  { %114 = shalt.err (!%p111_p0)
}
  0x23   :  { %53 = dma.vmem_to_hbm [thread:$0]  %s51_s20, 256, %s158_s2, [#allocation4]  }
  0x24   :  { %127 = dma.done.wait [#allocation4], 256  }
  0x25   :  { %128 = vsyncadd [#allocation4], 4294967040 }
  0x26   :  { %57 = vsyncpa [#allocation3], 1 }
  0x27   :  { %58 = vsyncpa [#allocation6], 1 }
  0x28   :  { %59 = vsyncpa [#allocation4], 1 }

</bundles_post_ra>
